<compile_context>
chip_gen: v7x
topology: tpu7x:2x2x1
jax: 0.10.0
libtpu: 0.0.40
codegen_flags: <defaults>
</compile_context>

<pallas_src>
import jax
import jax.numpy as jnp
from jax.experimental import pallas as pl
from jax.experimental.pallas import tpu as pltpu

BN_EPS = 1e-5
NEG_SLOPE = 0.2


def _round_up(x, m):
    return ((x + m - 1) // m) * m


def linear_unit_kernel(x_ref, w_ref, gamma_ref, beta_ref, o_ref, acc_ref):
    """Grid = (N tiles, K tiles). Full batch lives in every block."""
    k = pl.program_id(1)

    @pl.when(k == 0)
    def _():
        acc_ref[...] = jnp.zeros_like(acc_ref)

    # ---- Linear (bias-free; bias cancels under training-mode BN) ----
    acc_ref[...] += jnp.dot(
        x_ref[...], w_ref[...], preferred_element_type=jnp.float32
    )

    @pl.when(k == pl.num_programs(1) - 1)
    def _():
        y = acc_ref[...]                                   # (B, TN) f32
        # ---- BatchNorm1d, training mode: biased batch stats over dim 0 ----
        mean = jnp.mean(y, axis=0, keepdims=True)          # (1, TN)
        diff = y - mean
        var = jnp.mean(diff * diff, axis=0, keepdims=True)
        # Folded affine: single FMA over the (B, TN) tile.
        scale = gamma_ref[...] * jax.lax.rsqrt(var + BN_EPS)
        shift = beta_ref[...] - mean * scale
        y_bn = y * scale + shift
        # ---- LeakyReLU(0.2) ----
        o_ref[...] = jnp.where(y_bn > 0, y_bn, NEG_SLOPE * y_bn).astype(o_ref.dtype)


def linear_unit(x, w_t, gamma, beta, *, block_n=128, block_k=128):
    """x: (B, in_f); w_t: (in_f, out_f) (pre-transposed nn.Linear weight);
    gamma/beta: (1, out_f). Returns (B, out_f)."""
    B, in_f = x.shape
    out_f = w_t.shape[1]

    # Lane-dense tiles (multiples of 128); pad arrays up to tile multiples.
    tn = max(128, min(block_n, _round_up(out_f, 128)))
    tk = max(128, min(block_k, _round_up(in_f, 128)))
    in_p = _round_up(in_f, tk)
    out_p = _round_up(out_f, tn)

    x_p = jnp.pad(x, ((0, 0), (0, in_p - in_f)))
    w_p = jnp.pad(w_t, ((0, in_p - in_f), (0, out_p - out_f)))
    g_p = jnp.pad(gamma, ((0, 0), (0, out_p - out_f)), constant_values=1.0)
    b_p = jnp.pad(beta, ((0, 0), (0, out_p - out_f)))

    grid = (out_p // tn, in_p // tk)

    out = pl.pallas_call(
        linear_unit_kernel,
        out_shape=jax.ShapeDtypeStruct((B, out_p), x.dtype),
        grid_spec=pltpu.PrefetchScalarGridSpec(
            num_scalar_prefetch=0,
            grid=grid,
            in_specs=[
                pl.BlockSpec((B, tk), lambda n, k: (0, k)),   # x: stream K
                pl.BlockSpec((tk, tn), lambda n, k: (k, n)),  # w: K x N tile
                pl.BlockSpec((1, tn), lambda n, k: (0, n)),   # gamma
                pl.BlockSpec((1, tn), lambda n, k: (0, n)),   # beta
            ],
            out_specs=pl.BlockSpec((B, tn), lambda n, k: (0, n)),
            scratch_shapes=[pltpu.VMEM((B, tn), jnp.float32)],
        ),
        compiler_params=pltpu.CompilerParams(
            dimension_semantics=("parallel", "arbitrary"),
        ),
    )(x_p, w_p, g_p, b_p)

    return out[:, :out_f]


def _reference(x, w, b, gamma, beta):
    """Pure-JAX reference matching PyTorch LinearUnit forward (training mode),
    INCLUDING the Linear bias (to verify it cancels in the kernel)."""
    y = jnp.dot(x, w.T, precision=jax.lax.Precision.HIGHEST) + b
    m = y.mean(axis=0, keepdims=True)
    v = ((y - m) ** 2).mean(axis=0, keepdims=True)
    y = (y - m) / jnp.sqrt(v + BN_EPS) * gamma + beta
    return jnp.where(y > 0, y, NEG_SLOPE * y)


def _make_inputs(key, B, in_f, out_f):
    kx, kw, kb = jax.random.split(key, 3)
    x = jax.random.normal(kx, (B, in_f), dtype=jnp.float32)
    bound = 1.0 / (in_f ** 0.5)
    w = jax.random.uniform(kw, (out_f, in_f), minval=-bound, maxval=bound,
                           dtype=jnp.float32)
    b = jax.random.uniform(kb, (1, out_f), minval=-bound, maxval=bound,
                           dtype=jnp.float32)
    gamma = jnp.ones((1, out_f), dtype=jnp.float32)
    beta = jnp.zeros((1, out_f), dtype=jnp.float32)
    return x, w, b, gamma, beta


if __name__ == "__main__":
    key = jax.random.PRNGKey(0)

    # Small shape consistent with the module: batch=8, in_features=32, out_features=32.
    x, w, b, gamma, beta = _make_inputs(key, 8, 32, 32)
    out = linear_unit(x, w.T, gamma, beta)
    jax.block_until_ready(out)
    ref = _reference(x, w, b, gamma, beta)
    assert jnp.allclose(out, ref, atol=2e-4, rtol=2e-4), "small-shape mismatch"

    # Second check that actually exercises the (N, K) grid and K-accumulator.
    x2, w2, b2, gamma2, beta2 = _make_inputs(jax.random.PRNGKey(1), 16, 256, 384)
    out2 = linear_unit(x2, w2.T, gamma2, beta2, block_n=128, block_k=128)
    jax.block_until_ready(out2)
    ref2 = _reference(x2, w2, b2, gamma2, beta2)
    assert jnp.allclose(out2, ref2, atol=2e-4, rtol=2e-4), "grid-shape mismatch"

    print("KERNEL_OK")
</pallas_src>

<mosaic_0001>
module attributes {stable_mosaic.version = 11 : i64} {
  func.func @linear_unit_kernel(%arg0: i32, %arg1: i32, %arg2: memref<8x128xf32, #tpu.memory_space<vmem>>, %arg3: memref<128x128xf32, #tpu.memory_space<vmem>>, %arg4: memref<1x128xf32, #tpu.memory_space<vmem>>, %arg5: memref<1x128xf32, #tpu.memory_space<vmem>>, %arg6: memref<8x128xf32, #tpu.memory_space<vmem>>, %arg7: memref<8x128xf32, #tpu.memory_space<vmem>>) attributes {dimension_semantics = [#tpu.dimension_semantics<parallel>, #tpu.dimension_semantics<arbitrary>], iteration_bounds = array<i64: 1, 1>, scalar_prefetch = 0 : i64, scratch_operands = 1 : i64, tpu.core_type = #tpu.core_type<tc>, window_params = [{transform_indices = @transform_0, window_bounds = array<i64: 8, 128>}, {transform_indices = @transform_1, window_bounds = array<i64: 128, 128>}, {transform_indices = @transform_2, window_bounds = array<i64: 1, 128>}, {transform_indices = @transform_3, window_bounds = array<i64: 1, 128>}, {transform_indices = @transform_4, window_bounds = array<i64: 8, 128>}]} {
    %c0_i32 = arith.constant 0 : i32
    %0 = arith.cmpi eq, %arg1, %c0_i32 : i32
    %1 = arith.extui %0 : i1 to i32
    %c0_i32_0 = arith.constant 0 : i32
    %2 = arith.cmpi ne, %1, %c0_i32_0 : i32
    scf.if %2 {
      %cst_10 = arith.constant 0.000000e+00 : f32
      %12 = vector.broadcast %cst_10 : f32 to vector<8x128xf32>
      %c0_11 = arith.constant 0 : index
      %c0_12 = arith.constant 0 : index
      %13 = vector.load %arg7[%c0_11, %c0_12] : memref<8x128xf32, #tpu.memory_space<vmem>>, vector<8x128xf32>
      tpu.vector_store %arg7[%c0_11, %c0_12], %12 {strides = array<i32>} : memref<8x128xf32, #tpu.memory_space<vmem>>, vector<8x128xf32>,
    } else {
    }
    %c0 = arith.constant 0 : index
    %c0_1 = arith.constant 0 : index
    %3 = vector.load %arg7[%c0, %c0_1] : memref<8x128xf32, #tpu.memory_space<vmem>>, vector<8x128xf32>
    %c0_2 = arith.constant 0 : index
    %c0_3 = arith.constant 0 : index
    %4 = vector.load %arg2[%c0_2, %c0_3] : memref<8x128xf32, #tpu.memory_space<vmem>>, vector<8x128xf32>
    %c0_4 = arith.constant 0 : index
    %c0_5 = arith.constant 0 : index
    %5 = vector.load %arg3[%c0_4, %c0_5] : memref<128x128xf32, #tpu.memory_space<vmem>>, vector<128x128xf32>
    %cst = arith.constant dense<0.000000e+00> : vector<8x128xf32>
    %6 = tpu.matmul %4, %5, %cst {dimension_numbers = #tpu.dot_dimension_numbers<[1], [0], [0], [1], [0, 0, 1, 1], [], []>} : vector<8x128xf32>, vector<128x128xf32>, vector<8x128xf32> -> vector<8x128xf32>
    %7 = arith.addf %3, %6 : vector<8x128xf32>
    %c0_6 = arith.constant 0 : index
    %c0_7 = arith.constant 0 : index
    %8 = vector.load %arg7[%c0_6, %c0_7] : memref<8x128xf32, #tpu.memory_space<vmem>>, vector<8x128xf32>
    tpu.vector_store %arg7[%c0_6, %c0_7], %7 {strides = array<i32>} : memref<8x128xf32, #tpu.memory_space<vmem>>, vector<8x128xf32>,
    %c0_i32_8 = arith.constant 0 : i32
    %9 = arith.cmpi eq, %arg1, %c0_i32_8 : i32
    %10 = arith.extui %9 : i1 to i32
    %c0_i32_9 = arith.constant 0 : i32
    %11 = arith.cmpi ne, %10, %c0_i32_9 : i32
    scf.if %11 {
      %c0_10 = arith.constant 0 : index
      %c0_11 = arith.constant 0 : index
      %12 = vector.load %arg7[%c0_10, %c0_11] : memref<8x128xf32, #tpu.memory_space<vmem>>, vector<8x128xf32>
      %cst_12 = arith.constant dense<0.000000e+00> : vector<128xf32>
      %13 = vector.multi_reduction <add>, %12, %cst_12 [0] : vector<8x128xf32> to vector<128xf32>
      %14 = vector.shape_cast %13 : vector<128xf32> to vector<1x128xf32>
      %cst_13 = arith.constant 8.000000e+00 : f32
      %15 = vector.broadcast %cst_13 : f32 to vector<1x128xf32>
      %16 = arith.divf %14, %15 : vector<1x128xf32>
      %17 = vector.broadcast %16 : vector<1x128xf32> to vector<8x128xf32>
      %18 = arith.subf %12, %17 : vector<8x128xf32>
      %19 = arith.mulf %18, %18 : vector<8x128xf32>
      %cst_14 = arith.constant dense<0.000000e+00> : vector<128xf32>
      %20 = vector.multi_reduction <add>, %19, %cst_14 [0] : vector<8x128xf32> to vector<128xf32>
      %21 = vector.shape_cast %20 : vector<128xf32> to vector<1x128xf32>
      %cst_15 = arith.constant 8.000000e+00 : f32
      %22 = vector.broadcast %cst_15 : f32 to vector<1x128xf32>
      %23 = arith.divf %21, %22 : vector<1x128xf32>
      %c0_16 = arith.constant 0 : index
      %c0_17 = arith.constant 0 : index
      %24 = vector.load %arg4[%c0_16, %c0_17] : memref<1x128xf32, #tpu.memory_space<vmem>>, vector<1x128xf32>
      %cst_18 = arith.constant 9.99999974E-6 : f32
      %25 = vector.broadcast %cst_18 : f32 to vector<1x128xf32>
      %26 = arith.addf %23, %25 : vector<1x128xf32>
      %27 = math.rsqrt %26 : vector<1x128xf32>
      %28 = arith.mulf %24, %27 : vector<1x128xf32>
      %c0_19 = arith.constant 0 : index
      %c0_20 = arith.constant 0 : index
      %29 = vector.load %arg5[%c0_19, %c0_20] : memref<1x128xf32, #tpu.memory_space<vmem>>, vector<1x128xf32>
      %30 = arith.mulf %16, %28 : vector<1x128xf32>
      %31 = arith.subf %29, %30 : vector<1x128xf32>
      %32 = vector.broadcast %28 : vector<1x128xf32> to vector<8x128xf32>
      %33 = arith.mulf %12, %32 : vector<8x128xf32>
      %34 = vector.broadcast %31 : vector<1x128xf32> to vector<8x128xf32>
      %35 = arith.addf %33, %34 : vector<8x128xf32>
      %cst_21 = arith.constant 0.000000e+00 : f32
      %36 = vector.broadcast %cst_21 : f32 to vector<8x128xf32>
      %37 = arith.cmpf ogt, %35, %36 : vector<8x128xf32>
      %cst_22 = arith.constant 2.000000e-01 : f32
      %38 = vector.broadcast %cst_22 : f32 to vector<8x128xf32>
      %39 = arith.mulf %38, %35 : vector<8x128xf32>
      %40 = arith.select %37, %35, %39 : vector<8x128xi1>, vector<8x128xf32>
      %c0_23 = arith.constant 0 : index
      %c0_24 = arith.constant 0 : index
      %41 = vector.load %arg6[%c0_23, %c0_24] : memref<8x128xf32, #tpu.memory_space<vmem>>, vector<8x128xf32>
      tpu.vector_store %arg6[%c0_23, %c0_24], %40 {strides = array<i32>} : memref<8x128xf32, #tpu.memory_space<vmem>>, vector<8x128xf32>,
    } else {
    }
    return
  }
  func.func @transform_0(%arg0: i32, %arg1: i32) -> (i32, i32) {
    %c0_i32 = arith.constant 0 : i32
    %c0_i32_0 = arith.constant 0 : i32
    return %c0_i32, %arg1 : i32, i32
  }
  func.func @transform_1(%arg0: i32, %arg1: i32) -> (i32, i32) {
    %c0_i32 = arith.constant 0 : i32
    return %arg1, %arg0 : i32, i32
  }
  func.func @transform_2(%arg0: i32, %arg1: i32) -> (i32, i32) {
    %c0_i32 = arith.constant 0 : i32
    %c0_i32_0 = arith.constant 0 : i32
    return %c0_i32, %arg0 : i32, i32
  }
  func.func @transform_3(%arg0: i32, %arg1: i32) -> (i32, i32) {
    %c0_i32 = arith.constant 0 : i32
    %c0_i32_0 = arith.constant 0 : i32
    return %c0_i32, %arg0 : i32, i32
  }
  func.func @transform_4(%arg0: i32, %arg1: i32) -> (i32, i32) {
    %c0_i32 = arith.constant 0 : i32
    %c0_i32_0 = arith.constant 0 : i32
    return %c0_i32, %arg0 : i32, i32
  }
}

</mosaic_0001>

<bundles_post_ra>
// kernel: tpu_custom_call.1
= control target key start
LH: loop header
LB: loop body
LE: loop exit
PB: predicated region body
PF: predicated region fallthrough
CT: control target
= control target key end

     0   :  { %9 = vsyncpa [#allocation4], 0  ;;  %s441_s0 = inlined_call_operand.hbm [shape: f32[8,128], index: 0, kind: input, shape index: {}]   ;;  %s442_s1 = inlined_call_operand.hbm [shape: f32[128,128], index: 1, kind: input, shape index: {}]   ;;  %s443_s2 = inlined_call_operand.vmem [shape: f32[1,128], index: 2, kind: input, shape index: {}]   ;;  %s444_s3 = inlined_call_operand.vmem [shape: f32[1,128], index: 3, kind: input, shape index: {}]   ;;  %s445_s4 = inlined_call_operand.hbm [shape: f32[8,128], index: 4, kind: output, shape index: {}]  }
   0x1   :  { %10 = vsyncpa [#allocation7], 0 }
   0x2   :  { %11 = vsyncpa [#allocation5], 0  ;;  %s359_s15 = smov [#allocation3]   ;;  %s360_s17 = smov [#allocation6]  }
   0x3   :  { %s18_s16 = sshll.u32 %s359_s15, 4  ;;  %s27_s18 = sshll.u32 %s360_s17, 4  ;;  %s19_s16 = int_to_ptr.vmem [resolvable:$true] %s18_s16  ;;  %s392_s18 = int_to_ptr.vmem [resolvable:$true] %s27_s18 }
   0x4   :  { %s287_s21 = scalar_lea.hbm %s441_s0, 128 }
   0x5   :  { %p288_p0 = scmp.ne.s32.totalorder %s441_s0, %s287_s21  ;;  %p291_p1 = scmp.lt.u32.totalorder %s287_s21, %s441_s0 }
   0x7   :  { %p293_p2 = pnand %p291_p1, %p288_p0 }
   0x9   :  { %296 = shalt.err (!%p293_p2)
}
   0xa   :  { %s297_s26 = scalar_lea.vmem %s19_s16, 128  ;;  %p302_p4 = scmp.lt.s32.totalorder %s19_s16, %s19_s16 }
   0xb   :  { %p298_p3 = scmp.ne.s32.totalorder %s19_s16, %s297_s26  ;;  %p303_p5 = scmp.lt.s32.totalorder %s297_s26, %s297_s26 }
   0xd   :  { %p304_p6 = por %p303_p5, %p302_p4 }
   0xf   :  { %p305_p7 = pnand %p304_p6, %p298_p3 }
  0x11   :  { %308 = shalt.err (!%p305_p7)
}
  0x12   :  { %21 = dma.hbm_to_vmem [thread:$0]  %s441_s0, 128, %s19_s16, [#allocation4]  }
  0x13   :  { %s309_s5 = scalar_lea.hbm %s442_s1, 2048 }
  0x14   :  { %p310_p8 = scmp.ne.s32.totalorder %s442_s1, %s309_s5  ;;  %p313_p9 = scmp.lt.u32.totalorder %s309_s5, %s442_s1 }
  0x16   :  { %p315_p10 = pnand %p313_p9, %p310_p8 }
  0x18   :  { %318 = shalt.err (!%p315_p10)
}
  0x19   :  { %s319_s10 = scalar_lea.vmem %s392_s18, 2048  ;;  %p324_p12 = scmp.lt.s32.totalorder %s392_s18, %s392_s18 }
  0x1a   :  { %p320_p11 = scmp.ne.s32.totalorder %s392_s18, %s319_s10  ;;  %p325_p13 = scmp.lt.s32.totalorder %s319_s10, %s319_s10 }
  0x1c   :  { %p326_p0 = por %p325_p13, %p324_p12 }
  0x1e   :  { %p327_p1 = pnand %p326_p0, %p320_p11 }
  0x20   :  { %330 = shalt.err (!%p327_p1)
}
  0x21   :  { %s361_s0 = smov 128   ;;  %s362_s11 = smov 8  }
  0x22   :  { %33 = dma.hbm_to_vmem [thread:$0]  %s442_s1, 2048, %s392_s18, [#allocation7], %s361_s0, %s361_s0, %s362_s11  }
  0x23   :  { %353 = dma.done.wait [#allocation4], 128  }
  0x24   :  { %354 = vsyncadd [#allocation4], 4294967168 }
  0x25   :  { %355 = dma.done.wait [#allocation7], 2048  }
  0x26   :  { %356 = vsyncadd [#allocation7], 4294965248  ;;  %v363_v0 = vmov 0.0|0.0   ;;  %vm364_vm0 = vmmov 0   ;;  %v365_v1 = vmov 0.0   ;;  %v51_v2 = vld [vmem:[#allocation6] sm:$0xff]  ;;  %v168_v46 = vlaneseq }
  0x27   :  { %253 = vmatprep.subr.bf16.mxu0 %v363_v0  ;;  %250 = vmatprep.mubr.msk.f32.mxu0 %vm364_vm0, %v365_v1  ;;  %v52_v3 = vld [vmem:[#allocation6 + $0x8] sm:$0xff]  ;;  %v53_v4 = vld [vmem:[#allocation6 + $0x10] sm:$0xff]  ;;  %v54_v6 = vld [vmem:[#allocation6 + $0x18] sm:$0xff]  ;;  %s366_s17 = smov [#allocation8]  }
  0x28   :  { %v254_v5 = vpack.c.bf16 %v52_v3, %v51_v2  ;;  %v257_v7 = vpack.c.bf16 %v54_v6, %v53_v4  ;;  %v55_v8 = vld [vmem:[#allocation6 + $0x20] sm:$0xff]  ;;  %v56_v9 = vld [vmem:[#allocation6 + $0x28] sm:$0xff]  ;;  %v57_v11 = vld [vmem:[#allocation6 + $0x30] sm:$0xff]  ;;  %v169_v47 = vshrl.u32 %v168_v46, 7  ;;  %s191_s18 = sshll.u32 %s366_s17, 4  ;;  %s192_s18 = int_to_ptr.vmem [resolvable:$true] %s191_s18 }
  0x29   :  { %v260_v10 = vpack.c.bf16 %v56_v9, %v55_v8  ;;  %v58_v12 = vld [vmem:[#allocation6 + $0x38] sm:$0xff]  ;;  %v59_v14 = vld [vmem:[#allocation6 + $0x40] sm:$0xff]  ;;  %v60_v15 = vld [vmem:[#allocation6 + $0x48] sm:$0xff]  ;;  %p336_p3 = scmp.lt.s32.totalorder %s192_s18, %s192_s18 }
  0x2a   :  { %255 = vmatpush3.bf16.msra.mxu0 %v254_v5  ;;  %v263_v13 = vpack.c.bf16 %v58_v12, %v57_v11  ;;  %v266_v16 = vpack.c.bf16 %v60_v15, %v59_v14  ;;  %v61_v17 = vld [vmem:[#allocation6 + $0x50] sm:$0xff]  ;;  %v62_v18 = vld [vmem:[#allocation6 + $0x58] sm:$0xff]  ;;  %v63_v20 = vld [vmem:[#allocation6 + $0x60] sm:$0xff]  ;;  %v170_v49 = vsub.s32 0, %v169_v47 }
  0x2b   :  { %256 = vmatprep.subr.bf16.mxu0 %v363_v0  ;;  %v269_v19 = vpack.c.bf16 %v62_v18, %v61_v17  ;;  %v64_v21 = vld [vmem:[#allocation6 + $0x68] sm:$0xff]  ;;  %v65_v23 = vld [vmem:[#allocation6 + $0x70] sm:$0xff]  ;;  %v66_v24 = vld [vmem:[#allocation6 + $0x78] sm:$0xff] }
  0x2c   :  { %v272_v22 = vpack.c.bf16 %v64_v21, %v63_v20  ;;  %v275_v25 = vpack.c.bf16 %v66_v24, %v65_v23  ;;  %v50_v26 = vld [vmem:[#allocation3] sm:$0xff] }
  0x2d   :  { %v160_v48 = vld [vmem:[%s443_s2] sm:$0x1]  ;;  %s331_s2 = scalar_lea.vmem %s192_s18, 128 }
  0x2e   :  { %258 = vmatpush3.bf16.msra.mxu0 %v257_v7  ;;  %v164_v52 = vld [vmem:[%s444_s3] sm:$0x1]  ;;  %p332_p2 = scmp.ne.s32.totalorder %s192_s18, %s331_s2  ;;  %p337_p4 = scmp.lt.s32.totalorder %s331_s2, %s331_s2 }
  0x2f   :  { %259 = vmatprep.subr.bf16.mxu0 %v363_v0 }
  0x30   :  { %p338_p5 = por %p337_p4, %p336_p3 }
  0x32   :  { %261 = vmatpush3.bf16.msra.mxu0 %v260_v10  ;;  %p339_p6 = pnand %p338_p5, %p332_p2 }
  0x33   :  { %262 = vmatprep.subr.bf16.mxu0 %v363_v0 }
  0x36   :  { %264 = vmatpush3.bf16.msra.mxu0 %v263_v13 }
  0x37   :  { %265 = vmatprep.subr.bf16.mxu0 %v363_v0 }
  0x3a   :  { %267 = vmatpush3.bf16.msra.mxu0 %v266_v16 }
  0x3b   :  { %268 = vmatprep.subr.bf16.mxu0 %v363_v0 }
  0x3e   :  { %270 = vmatpush3.bf16.msra.mxu0 %v269_v19 }
  0x3f   :  { %271 = vmatprep.subr.bf16.mxu0 %v363_v0 }
  0x42   :  { %273 = vmatpush3.bf16.msra.mxu0 %v272_v22 }
  0x43   :  { %274 = vmatprep.subr.bf16.mxu0 %v363_v0 }
  0x46   :  { %276 = vmatpush3.bf16.msra.mxu0 %v275_v25 }
  0x49   :  { %251 = vmatmul.mubr.f32.vlgmr.msra.gmra.mrb[0].mxu0 %v50_v26 }
 0x11c   :  { %v133_v27 = vpop.f32.mrb[0].mxu0 }
 0x11d   :  { %v143_v28 = vrot.slane %v133_v27, 4  ;;  %v252_v29 = vpop.f32.mrb[1].mxu0 }
 0x11f   :  { %v144_v30 = vadd.f32 %v143_v28, %v133_v27 }
 0x121   :  { %v145_v31 = vrot.slane %v144_v30, 2 }
 0x123   :  { %v146_v32 = vadd.f32 %v145_v31, %v144_v30 }
 0x125   :  { %v147_v33 = vrot.slane %v146_v32, 1 }
 0x127   :  { %v148_v34 = vadd.f32 %v147_v33, %v146_v32 }
 0x129   :  { %v150_v35 = vmul.f32 0.125, %v148_v34 }
 0x12b   :  { %v151_v36 = vsub.f32 %v133_v27, %v150_v35 }
 0x12d   :  { %v152_v37 = vmul.f32 %v151_v36, %v151_v36 }
 0x12f   :  { %v153_v38 = vrot.slane %v152_v37, 4 }
 0x131   :  { %v154_v39 = vadd.f32 %v153_v38, %v152_v37 }
 0x133   :  { %v155_v40 = vrot.slane %v154_v39, 2 }
 0x135   :  { %v156_v41 = vadd.f32 %v155_v40, %v154_v39 }
 0x137   :  { %v157_v42 = vrot.slane %v156_v41, 1 }
 0x139   :  { %v158_v43 = vadd.f32 %v157_v42, %v156_v41 }
 0x13b   :  { %v159_v44 = vmul.f32 0.125, %v158_v43 }
 0x13d   :  { %v161_v45 = vadd.f32 1e-05, %v159_v44 }
 0x13f   :  { %285 = vrsqrt.f32 %v161_v45 }
 0x149   :  { %v286_v50 = vpop.eup %285 }
 0x14a   :  { %v163_v51 = vmul.f32 %v286_v50, %v160_v48 }
 0x14c   :  { %v165_v53 = vmul.f32 %v163_v51, %v150_v35  ;;  %v171_v54 = vrot.slane %v163_v51, %v170_v49 }
 0x14e   :  { %v166_v55 = vsub.f32 %v164_v52, %v165_v53  ;;  %v173_v56 = vmul.f32 %v171_v54, %v133_v27 }
 0x150   :  { %v178_v57 = vrot.slane %v166_v55, %v170_v49 }
 0x152   :  { %v180_v58 = vadd.f32 %v178_v57, %v173_v56 }
 0x154   :  { %vm181_vm1 = vcmp.gt.f32.partialorder %v180_v58, 0.0  ;;  %v182_v59 = vmul.f32 0.2, %v180_v58 }
 0x156   :  { %v183_v60 = vsel %vm181_vm1, %v180_v58, %v182_v59 }
 0x157   :  { %184 = vst [vmem:[#allocation8] sm:$0xff] %v183_v60 }
 0x158   :  { %342 = shalt.err (!%p339_p6)
}
 0x159   :  { %s343_s20 = scalar_lea.hbm %s445_s4, 128 }
 0x15a   :  { %p344_p7 = scmp.ne.s32.totalorder %s445_s4, %s343_s20  ;;  %p347_p8 = scmp.lt.u32.totalorder %s343_s20, %s445_s4 }
 0x15c   :  { %p349_p9 = pnand %p347_p8, %p344_p7 }
 0x15e   :  { %352 = shalt.err (!%p349_p9)
}
 0x15f   :  { %194 = dma.vmem_to_hbm [thread:$0]  %s192_s18, 128, %s445_s4, [#allocation5]  }
 0x160   :  { %357 = dma.done.wait [#allocation5], 128  }
 0x161   :  { %358 = vsyncadd [#allocation5], 4294967168 }
 0x162   :  { %198 = vsyncpa [#allocation4], 1 }
 0x163   :  { %199 = vsyncpa [#allocation7], 1 }
 0x164   :  { %200 = vsyncpa [#allocation5], 1 }

</bundles_post_ra>
